<compile_context>
chip_gen: v5e
topology: v5e:2x2
jax: 0.10.0
libtpu: 0.0.40
codegen_flags: <defaults>
</compile_context>

<pallas_src>
import math

import jax
import jax.numpy as jnp
from jax import lax
from jax.experimental import pallas as pl
from jax.experimental.pallas import tpu as pltpu


# ----------------------------------------------------------------------------
# Weight packing helpers (XLA side, tiny tensors, runs once per call)
# ----------------------------------------------------------------------------
def _circ_perm(W, dx):
    # P_dx[xi, xo] = 1 iff xi == (xo + dx - 1) mod W   (circular padding=1 in width)
    return jnp.roll(jnp.eye(W, dtype=jnp.float32), dx - 1, axis=0)


def _banded_circulant(w_hwio, W):
    """(3,3,Cin,Cout) -> (3*W*Cin, W*Cout) stacked banded-circulant weights for the
    width-fused layout.  Row block dy multiplies input row (y+dy-1) mod H; within a
    block, row xi*Cin+c hits column xo*Cout+f iff xi == (xo+dx-1) mod W."""
    _, _, Cin, Cout = w_hwio.shape
    blocks = []
    for dy in range(3):
        m = jnp.zeros((W * Cin, W * Cout), jnp.float32)
        for dx in range(3):
            m = m + jnp.kron(_circ_perm(W, dx), w_hwio[dy, dx].astype(jnp.float32))
        blocks.append(m)
    return jnp.concatenate(blocks, axis=0)


def _fold_1x1_into_3x3(w1, w3):
    # conv3x3(conv1x1(x, w1), w3) == conv3x3(x, w') with w'[dy,dx] = w1 @ w3[dy,dx]
    return jnp.einsum("ic,hwcf->hwif", w1.astype(jnp.float32), w3.astype(jnp.float32))


def _fold_1x1_bias(b1, w3, b3):
    # bias after folding the 1x1 into the 3x3: b3 + sum_{dy,dx} b1 @ w3[dy,dx]
    return b3.astype(jnp.float32) + jnp.einsum(
        "c,hwcf->f", b1.astype(jnp.float32), w3.astype(jnp.float32))


# ----------------------------------------------------------------------------
# Fused forward pass: one pallas_call for the whole Inception block
# ----------------------------------------------------------------------------
def inception_nd_v3_forward(x_nchw, p):
    N, Cin, H, W = x_nchw.shape
    c1 = p["b1_w1"].shape[1]
    c2 = p["b2_w1"].shape[1]
    c3 = p["b3_w1"].shape[1]
    c4 = p["b4_w1"].shape[1]
    Ctot = c1 + c2 + c3 + c4
    cA = c1 + c2 + c4
    Kx = W * Cin

    # ---- width-fused NHWC input (one transpose + reshape, f32 kept for branch3) ----
    x_wf = jnp.transpose(x_nchw, (0, 2, 3, 1)).reshape(N, H, Kx).astype(jnp.float32)

    # ---- stage A: branch1 (1x1 folded into its first 3x3), branch2 (1x1 folded
    #      into its 3x3), branch4 (1x1 as centre tap) -> ONE banded matmul -----------
    wA1 = _banded_circulant(_fold_1x1_into_3x3(p["b1_w1"], p["b1_w2"]), W)
    wA2 = _banded_circulant(_fold_1x1_into_3x3(p["b2_w1"], p["b2_w2"]), W)
    w4_tap = jnp.zeros((3, 3, Cin, c4), jnp.float32).at[1, 1].set(
        p["b4_w1"].astype(jnp.float32))
    wA4 = _banded_circulant(w4_tap, W)
    wA = jnp.concatenate([wA1, wA2, wA4], axis=1).astype(jnp.bfloat16)  # (3*Kx, W*cA)
    bA = jnp.concatenate([
        jnp.tile(_fold_1x1_bias(p["b1_b1"], p["b1_w2"], p["b1_b2"]), W),
        jnp.tile(_fold_1x1_bias(p["b2_b1"], p["b2_w2"], p["b2_b2"]), W),
        jnp.tile(p["b4_b1"].astype(jnp.float32), W)]).reshape(1, -1)

    # ---- stage B: branch1's second circular 3x3 --------------------------------
    wB = _banded_circulant(p["b1_w3"], W).astype(jnp.bfloat16)          # (3*W*c1, W*c1)
    bB = jnp.tile(p["b1_b3"].astype(jnp.float32), W).reshape(1, -1)

    # ---- branch3: pointwise conv as block-diagonal matmul (f32) -----------------
    wP = jnp.kron(jnp.eye(W, dtype=jnp.float32), p["b3_w1"].astype(jnp.float32))
    bP = jnp.tile(p["b3_b1"].astype(jnp.float32), W).reshape(1, -1)

    neg = float(jnp.finfo(jnp.float32).min)

    def kernel(x_ref, wA_ref, bA_ref, wB_ref, bB_ref, wP_ref, bP_ref, o_ref):
        x = x_ref[...]                                        # (H, W*Cin) f32

        def circular_rows_stacked(a):
            # (H, K) -> (H, 3K): lanes [row y-1 | row y | row y+1], circular in H.
            pad = jnp.concatenate([a[H - 1:H, :], a, a[0:1, :]], axis=0)
            return jnp.concatenate(
                [pad[0:H, :], pad[1:H + 1, :], pad[2:H + 2, :]], axis=1)

        # stage A: one MXU matmul covers branch1-mid, branch2 and branch4.
        xA = circular_rows_stacked(x).astype(jnp.bfloat16)                  # (H, 3*W*Cin)
        accA = jnp.dot(xA, wA_ref[...],
                       preferred_element_type=jnp.float32) + bA_ref[...]
        b1_mid = accA[:, :W * c1]                                           # (H, W*c1)
        o2 = accA[:, W * c1:W * (c1 + c2)]
        o4 = accA[:, W * (c1 + c2):]

        # stage B: branch1's second circular 3x3 (input stays in registers/VMEM).
        xB = circular_rows_stacked(b1_mid).astype(jnp.bfloat16)            # (H, 3*W*c1)
        o1 = jnp.dot(xB, wB_ref[...],
                     preferred_element_type=jnp.float32) + bB_ref[...]

        # branch3: width-fused 3x3/s1/p1 max-pool (-inf borders, PyTorch semantics)
        # followed by the block-diagonal 1x1 matmul, all in f32.
        row_neg = jnp.full((1, Kx), neg, jnp.float32)
        xp = jnp.concatenate([row_neg, x, row_neg], axis=0)                 # (H+2, Kx)
        col_neg = jnp.full((H + 2, Cin), neg, jnp.float32)
        left = jnp.concatenate([xp[:, Cin:], col_neg], axis=1)              # tap x+1
        right = jnp.concatenate([col_neg, xp[:, :Kx - Cin]], axis=1)        # tap x-1
        mdx = jnp.maximum(jnp.maximum(left, right), xp)
        pooled = jnp.maximum(jnp.maximum(mdx[0:H, :], mdx[1:H + 1, :]),
                             mdx[2:H + 2, :])                               # (H, Kx)
        o3 = jnp.dot(pooled, wP_ref[...],
                     preferred_element_type=jnp.float32) + bP_ref[...]

        # single lane-dense store, branch-grouped: [b1 | b2 | b3 | b4]
        o_ref[...] = jnp.concatenate([o1, o2, o3, o4], axis=1).astype(o_ref.dtype)

    flops_per_img = 2 * H * (3 * Kx * W * cA + 3 * W * c1 * W * c1 + Kx * W * c3)
    bytes_accessed = (N * H * Kx * 4 + N * H * W * Ctot * 4
                      + (3 * Kx * W * cA + 3 * W * c1 * W * c1) * 2
                      + Kx * W * c3 * 4
                      + (W * cA + W * c1 + W * c3) * 4)

    out_wf = pl.pallas_call(
        kernel,
        out_shape=jax.ShapeDtypeStruct((N, H, W * Ctot), jnp.float32),
        grid_spec=pltpu.PrefetchScalarGridSpec(
            num_scalar_prefetch=0,
            grid=(N,),
            in_specs=[
                pl.BlockSpec((None, H, Kx), lambda n: (n, 0, 0)),
                pl.BlockSpec((3 * Kx, W * cA), lambda n: (0, 0)),
                pl.BlockSpec((1, W * cA), lambda n: (0, 0)),
                pl.BlockSpec((3 * W * c1, W * c1), lambda n: (0, 0)),
                pl.BlockSpec((1, W * c1), lambda n: (0, 0)),
                pl.BlockSpec((Kx, W * c3), lambda n: (0, 0)),
                pl.BlockSpec((1, W * c3), lambda n: (0, 0)),
            ],
            out_specs=pl.BlockSpec((None, H, W * Ctot), lambda n: (n, 0, 0)),
        ),
        compiler_params=pltpu.CompilerParams(
            dimension_semantics=("parallel",)),
        cost_estimate=pl.CostEstimate(
            flops=N * flops_per_img, transcendentals=0,
            bytes_accessed=bytes_accessed),
    )(x_wf, wA, bA, wB, bB, wP, bP)

    # ---- branch-grouped width-fused -> NCHW channel concat (cheap XLA glue) -------
    s1, s2, s3 = W * c1, W * (c1 + c2), W * (c1 + c2 + c3)
    o1 = out_wf[..., :s1].reshape(N, H, W, c1)
    o2 = out_wf[..., s1:s2].reshape(N, H, W, c2)
    o3 = out_wf[..., s2:s3].reshape(N, H, W, c3)
    o4 = out_wf[..., s3:].reshape(N, H, W, c4)
    out = jnp.concatenate([o1, o2, o3, o4], axis=-1)
    return jnp.transpose(out, (0, 3, 1, 2))


# ----------------------------------------------------------------------------
# Parameter init (deterministic, PyTorch-style uniform bounds, synthetic)
# ----------------------------------------------------------------------------
def init_params(key, in_fts, out_fts):
    if not isinstance(out_fts, (list, tuple)):
        out_fts = [out_fts // 4] * 4

    def conv_init(k, kh, kw, cin, cout):
        kw_, kb_ = jax.random.split(k)
        fan_in = cin * kh * kw
        bound = 1.0 / math.sqrt(fan_in)
        w = jax.random.uniform(kw_, (kh, kw, cin, cout), jnp.float32, -bound, bound)
        b = jax.random.uniform(kb_, (cout,), jnp.float32, -bound, bound)
        if kh == 1 and kw == 1:
            w = w.reshape(cin, cout)
        return w, b

    keys = jax.random.split(key, 7)
    p = {}
    p["b1_w1"], p["b1_b1"] = conv_init(keys[0], 1, 1, in_fts, out_fts[0])
    p["b1_w2"], p["b1_b2"] = conv_init(keys[1], 3, 3, out_fts[0], out_fts[0])
    p["b1_w3"], p["b1_b3"] = conv_init(keys[2], 3, 3, out_fts[0], out_fts[0])
    p["b2_w1"], p["b2_b1"] = conv_init(keys[3], 1, 1, in_fts, out_fts[1])
    p["b2_w2"], p["b2_b2"] = conv_init(keys[4], 3, 3, out_fts[1], out_fts[1])
    p["b3_w1"], p["b3_b1"] = conv_init(keys[5], 1, 1, in_fts, out_fts[2])
    p["b4_w1"], p["b4_b1"] = conv_init(keys[6], 1, 1, in_fts, out_fts[3])
    return p


# ----------------------------------------------------------------------------
# Pure-JAX reference (independent implementation for correctness check)
# ----------------------------------------------------------------------------
def _ref_conv(x_nhwc, w, b, circular):
    w4 = w if w.ndim == 4 else w.reshape(1, 1, *w.shape)
    if circular:
        x_nhwc = jnp.pad(x_nhwc, ((0, 0), (1, 1), (1, 1), (0, 0)), mode="wrap")
    out = lax.conv_general_dilated(
        x_nhwc, w4, window_strides=(1, 1), padding="VALID",
        dimension_numbers=("NHWC", "HWIO", "NHWC"),
        precision=lax.Precision.HIGHEST)
    return out + b


def _ref_maxpool(x_nhwc):
    neg = jnp.finfo(x_nhwc.dtype).min
    xp = jnp.pad(x_nhwc, ((0, 0), (1, 1), (1, 1), (0, 0)), constant_values=neg)
    return lax.reduce_window(xp, neg, lax.max, (1, 3, 3, 1), (1, 1, 1, 1), "VALID")


def reference_forward(x_nchw, p):
    x = jnp.transpose(x_nchw, (0, 2, 3, 1))
    b1 = _ref_conv(x, p["b1_w1"], p["b1_b1"], False)
    b1 = _ref_conv(b1, p["b1_w2"], p["b1_b2"], True)
    b1 = _ref_conv(b1, p["b1_w3"], p["b1_b3"], True)
    b2 = _ref_conv(x, p["b2_w1"], p["b2_b1"], False)
    b2 = _ref_conv(b2, p["b2_w2"], p["b2_b2"], True)
    b3 = _ref_conv(_ref_maxpool(x), p["b3_w1"], p["b3_b1"], False)
    b4 = _ref_conv(x, p["b4_w1"], p["b4_b1"], False)
    out = jnp.concatenate([b1, b2, b3, b4], axis=-1)
    return jnp.transpose(out, (0, 3, 1, 2))


if __name__ == "__main__":
    key = jax.random.PRNGKey(0)
    kx, kp = jax.random.split(key)

    N, C, H, W = 2, 4, 16, 16            # small NCHW input
    out_fts = 16                          # -> each branch produces 4 channels
    x = jax.random.normal(kx, (N, C, H, W), jnp.float32)
    params = init_params(kp, C, out_fts)

    fwd = jax.jit(inception_nd_v3_forward)
    out = jax.block_until_ready(fwd(x, params))
    assert out.shape == (N, out_fts, H, W), out.shape

    ref = reference_forward(x, params)
    err = float(jnp.max(jnp.abs(out - ref)))
    # branches 1/2/4 use bf16 MXU matmuls (f32 accumulation) vs an f32/HIGHEST
    # reference; branch3 is exact f32.  Tolerance matches that rounding.
    assert err < 2e-2, f"max abs error vs reference: {err}"

    print("KERNEL_OK")
</pallas_src>

<mosaic_0001>
module attributes {stable_mosaic.version = 11 : i64} {
  func.func @kernel(%arg0: i32, %arg1: memref<1x16x64xf32, #tpu.memory_space<vmem>>, %arg2: memref<192x192xbf16, #tpu.memory_space<vmem>>, %arg3: memref<1x192xf32, #tpu.memory_space<vmem>>, %arg4: memref<192x64xbf16, #tpu.memory_space<vmem>>, %arg5: memref<1x64xf32, #tpu.memory_space<vmem>>, %arg6: memref<64x64xf32, #tpu.memory_space<vmem>>, %arg7: memref<1x64xf32, #tpu.memory_space<vmem>>, %arg8: memref<1x16x256xf32, #tpu.memory_space<vmem>>) attributes {dimension_semantics = [#tpu.dimension_semantics<parallel>], iteration_bounds = array<i64: 2>, scalar_prefetch = 0 : i64, scratch_operands = 0 : i64, tpu.core_type = #tpu.core_type<tc>, window_params = [{transform_indices = @transform_0, window_bounds = array<i64: 1, 16, 64>}, {pipeline_mode = #tpu.pipeline_mode<synchronous>, transform_indices = @transform_1, window_bounds = array<i64: 192, 192>}, {pipeline_mode = #tpu.pipeline_mode<synchronous>, transform_indices = @transform_2, window_bounds = array<i64: 1, 192>}, {pipeline_mode = #tpu.pipeline_mode<synchronous>, transform_indices = @transform_3, window_bounds = array<i64: 192, 64>}, {pipeline_mode = #tpu.pipeline_mode<synchronous>, transform_indices = @transform_4, window_bounds = array<i64: 1, 64>}, {pipeline_mode = #tpu.pipeline_mode<synchronous>, transform_indices = @transform_5, window_bounds = array<i64: 64, 64>}, {pipeline_mode = #tpu.pipeline_mode<synchronous>, transform_indices = @transform_6, window_bounds = array<i64: 1, 64>}, {transform_indices = @transform_7, window_bounds = array<i64: 1, 16, 256>}]} {
    %c0 = arith.constant 0 : index
    %c0_0 = arith.constant 0 : index
    %c0_1 = arith.constant 0 : index
    %0 = vector.load %arg1[%c0, %c0_0, %c0_1] : memref<1x16x64xf32, #tpu.memory_space<vmem>>, vector<1x16x64xf32>
    %1 = vector.shape_cast %0 : vector<1x16x64xf32> to vector<16x64xf32>
    %2 = vector.extract_strided_slice %1 {offsets = [15, 0], sizes = [1, 64], strides = [1, 1]} : vector<16x64xf32> to vector<1x64xf32>
    %3 = vector.extract_strided_slice %1 {offsets = [0, 0], sizes = [1, 64], strides = [1, 1]} : vector<16x64xf32> to vector<1x64xf32>
    %4 = tpu.concatenate %2, %1, %3 in 0 : vector<1x64xf32>, vector<16x64xf32>, vector<1x64xf32> -> vector<18x64xf32>
    %5 = vector.extract_strided_slice %4 {offsets = [0, 0], sizes = [16, 64], strides = [1, 1]} : vector<18x64xf32> to vector<16x64xf32>
    %6 = vector.extract_strided_slice %4 {offsets = [1, 0], sizes = [16, 64], strides = [1, 1]} : vector<18x64xf32> to vector<16x64xf32>
    %7 = vector.extract_strided_slice %4 {offsets = [2, 0], sizes = [16, 64], strides = [1, 1]} : vector<18x64xf32> to vector<16x64xf32>
    %8 = tpu.concatenate %5, %6, %7 in 1 : vector<16x64xf32>, vector<16x64xf32>, vector<16x64xf32> -> vector<16x192xf32>
    %9 = arith.truncf %8 : vector<16x192xf32> to vector<16x192xbf16>
    %c0_2 = arith.constant 0 : index
    %c0_3 = arith.constant 0 : index
    %10 = vector.load %arg2[%c0_2, %c0_3] : memref<192x192xbf16, #tpu.memory_space<vmem>>, vector<192x192xbf16>
    %cst = arith.constant dense<0.000000e+00> : vector<16x192xf32>
    %11 = tpu.matmul %9, %10, %cst {dimension_numbers = #tpu.dot_dimension_numbers<[1], [0], [0], [1], [0, 0, 1, 1], [], []>} : vector<16x192xbf16>, vector<192x192xbf16>, vector<16x192xf32> -> vector<16x192xf32>
    %c0_4 = arith.constant 0 : index
    %c0_5 = arith.constant 0 : index
    %12 = vector.load %arg3[%c0_4, %c0_5] : memref<1x192xf32, #tpu.memory_space<vmem>>, vector<1x192xf32>
    %13 = vector.broadcast %12 : vector<1x192xf32> to vector<16x192xf32>
    %14 = arith.addf %11, %13 : vector<16x192xf32>
    %15 = vector.extract_strided_slice %14 {offsets = [0, 0], sizes = [16, 64], strides = [1, 1]} : vector<16x192xf32> to vector<16x64xf32>
    %16 = vector.extract_strided_slice %14 {offsets = [0, 64], sizes = [16, 64], strides = [1, 1]} : vector<16x192xf32> to vector<16x64xf32>
    %17 = vector.extract_strided_slice %14 {offsets = [0, 128], sizes = [16, 64], strides = [1, 1]} : vector<16x192xf32> to vector<16x64xf32>
    %18 = vector.extract_strided_slice %15 {offsets = [15, 0], sizes = [1, 64], strides = [1, 1]} : vector<16x64xf32> to vector<1x64xf32>
    %19 = vector.extract_strided_slice %15 {offsets = [0, 0], sizes = [1, 64], strides = [1, 1]} : vector<16x64xf32> to vector<1x64xf32>
    %20 = tpu.concatenate %18, %15, %19 in 0 : vector<1x64xf32>, vector<16x64xf32>, vector<1x64xf32> -> vector<18x64xf32>
    %21 = vector.extract_strided_slice %20 {offsets = [0, 0], sizes = [16, 64], strides = [1, 1]} : vector<18x64xf32> to vector<16x64xf32>
    %22 = vector.extract_strided_slice %20 {offsets = [1, 0], sizes = [16, 64], strides = [1, 1]} : vector<18x64xf32> to vector<16x64xf32>
    %23 = vector.extract_strided_slice %20 {offsets = [2, 0], sizes = [16, 64], strides = [1, 1]} : vector<18x64xf32> to vector<16x64xf32>
    %24 = tpu.concatenate %21, %22, %23 in 1 : vector<16x64xf32>, vector<16x64xf32>, vector<16x64xf32> -> vector<16x192xf32>
    %25 = arith.truncf %24 : vector<16x192xf32> to vector<16x192xbf16>
    %c0_6 = arith.constant 0 : index
    %c0_7 = arith.constant 0 : index
    %26 = vector.load %arg4[%c0_6, %c0_7] : memref<192x64xbf16, #tpu.memory_space<vmem>>, vector<192x64xbf16>
    %cst_8 = arith.constant dense<0.000000e+00> : vector<16x64xf32>
    %27 = tpu.matmul %25, %26, %cst_8 {dimension_numbers = #tpu.dot_dimension_numbers<[1], [0], [0], [1], [0, 0, 1, 1], [], []>} : vector<16x192xbf16>, vector<192x64xbf16>, vector<16x64xf32> -> vector<16x64xf32>
    %c0_9 = arith.constant 0 : index
    %c0_10 = arith.constant 0 : index
    %28 = vector.load %arg5[%c0_9, %c0_10] : memref<1x64xf32, #tpu.memory_space<vmem>>, vector<1x64xf32>
    %29 = vector.broadcast %28 : vector<1x64xf32> to vector<16x64xf32>
    %30 = arith.addf %27, %29 : vector<16x64xf32>
    %cst_11 = arith.constant -3.40282347E+38 : f32
    %31 = vector.broadcast %cst_11 : f32 to vector<1x64xf32>
    %32 = tpu.concatenate %31, %1, %31 in 0 : vector<1x64xf32>, vector<16x64xf32>, vector<1x64xf32> -> vector<18x64xf32>
    %cst_12 = arith.constant -3.40282347E+38 : f32
    %33 = vector.broadcast %cst_12 : f32 to vector<18x4xf32>
    %34 = vector.extract_strided_slice %32 {offsets = [0, 4], sizes = [18, 60], strides = [1, 1]} : vector<18x64xf32> to vector<18x60xf32>
    %35 = tpu.concatenate %34, %33 in 1 : vector<18x60xf32>, vector<18x4xf32> -> vector<18x64xf32>
    %36 = vector.extract_strided_slice %32 {offsets = [0, 0], sizes = [18, 60], strides = [1, 1]} : vector<18x64xf32> to vector<18x60xf32>
    %37 = tpu.concatenate %33, %36 in 1 : vector<18x4xf32>, vector<18x60xf32> -> vector<18x64xf32>
    %38 = arith.maximumf %35, %37 : vector<18x64xf32>
    %39 = arith.maximumf %38, %32 : vector<18x64xf32>
    %40 = vector.extract_strided_slice %39 {offsets = [0, 0], sizes = [16, 64], strides = [1, 1]} : vector<18x64xf32> to vector<16x64xf32>
    %41 = vector.extract_strided_slice %39 {offsets = [1, 0], sizes = [16, 64], strides = [1, 1]} : vector<18x64xf32> to vector<16x64xf32>
    %42 = arith.maximumf %40, %41 : vector<16x64xf32>
    %43 = vector.extract_strided_slice %39 {offsets = [2, 0], sizes = [16, 64], strides = [1, 1]} : vector<18x64xf32> to vector<16x64xf32>
    %44 = arith.maximumf %42, %43 : vector<16x64xf32>
    %c0_13 = arith.constant 0 : index
    %c0_14 = arith.constant 0 : index
    %45 = vector.load %arg6[%c0_13, %c0_14] : memref<64x64xf32, #tpu.memory_space<vmem>>, vector<64x64xf32>
    %cst_15 = arith.constant dense<0.000000e+00> : vector<16x64xf32>
    %46 = tpu.matmul %44, %45, %cst_15 {dimension_numbers = #tpu.dot_dimension_numbers<[1], [0], [0], [1], [0, 0, 1, 1], [], []>} : vector<16x64xf32>, vector<64x64xf32>, vector<16x64xf32> -> vector<16x64xf32>
    %c0_16 = arith.constant 0 : index
    %c0_17 = arith.constant 0 : index
    %47 = vector.load %arg7[%c0_16, %c0_17] : memref<1x64xf32, #tpu.memory_space<vmem>>, vector<1x64xf32>
    %48 = vector.broadcast %47 : vector<1x64xf32> to vector<16x64xf32>
    %49 = arith.addf %46, %48 : vector<16x64xf32>
    %50 = tpu.concatenate %30, %16, %49, %17 in 1 : vector<16x64xf32>, vector<16x64xf32>, vector<16x64xf32>, vector<16x64xf32> -> vector<16x256xf32>
    %c0_18 = arith.constant 0 : index
    %c0_19 = arith.constant 0 : index
    %c0_20 = arith.constant 0 : index
    %51 = vector.load %arg8[%c0_18, %c0_19, %c0_20] : memref<1x16x256xf32, #tpu.memory_space<vmem>>, vector<1x16x256xf32>
    %52 = vector.shape_cast %51 : vector<1x16x256xf32> to vector<16x256xf32>
    %53 = vector.shape_cast %50 : vector<16x256xf32> to vector<1x16x256xf32>
    tpu.vector_store %arg8[%c0_18, %c0_19, %c0_20], %53 {strides = array<i32>} : memref<1x16x256xf32, #tpu.memory_space<vmem>>, vector<1x16x256xf32>,
    return
  }
  func.func @transform_0(%arg0: i32) -> (i32, i32, i32) {
    %c0_i32 = arith.constant 0 : i32
    %c0_i32_0 = arith.constant 0 : i32
    %c0_i32_1 = arith.constant 0 : i32
    return %arg0, %c0_i32, %c0_i32_0 : i32, i32, i32
  }
  func.func @transform_1(%arg0: i32) -> (i32, i32) {
    %c0_i32 = arith.constant 0 : i32
    %c0_i32_0 = arith.constant 0 : i32
    %c0_i32_1 = arith.constant 0 : i32
    return %c0_i32, %c0_i32_0 : i32, i32
  }
  func.func @transform_2(%arg0: i32) -> (i32, i32) {
    %c0_i32 = arith.constant 0 : i32
    %c0_i32_0 = arith.constant 0 : i32
    %c0_i32_1 = arith.constant 0 : i32
    return %c0_i32, %c0_i32_0 : i32, i32
  }
  func.func @transform_3(%arg0: i32) -> (i32, i32) {
    %c0_i32 = arith.constant 0 : i32
    %c0_i32_0 = arith.constant 0 : i32
    %c0_i32_1 = arith.constant 0 : i32
    return %c0_i32, %c0_i32_0 : i32, i32
  }
  func.func @transform_4(%arg0: i32) -> (i32, i32) {
    %c0_i32 = arith.constant 0 : i32
    %c0_i32_0 = arith.constant 0 : i32
    %c0_i32_1 = arith.constant 0 : i32
    return %c0_i32, %c0_i32_0 : i32, i32
  }
  func.func @transform_5(%arg0: i32) -> (i32, i32) {
    %c0_i32 = arith.constant 0 : i32
    %c0_i32_0 = arith.constant 0 : i32
    %c0_i32_1 = arith.constant 0 : i32
    return %c0_i32, %c0_i32_0 : i32, i32
  }
  func.func @transform_6(%arg0: i32) -> (i32, i32) {
    %c0_i32 = arith.constant 0 : i32
    %c0_i32_0 = arith.constant 0 : i32
    %c0_i32_1 = arith.constant 0 : i32
    return %c0_i32, %c0_i32_0 : i32, i32
  }
  func.func @transform_7(%arg0: i32) -> (i32, i32, i32) {
    %c0_i32 = arith.constant 0 : i32
    %c0_i32_0 = arith.constant 0 : i32
    %c0_i32_1 = arith.constant 0 : i32
    return %arg0, %c0_i32, %c0_i32_0 : i32, i32, i32
  }
}

</mosaic_0001>

<bundles_post_ra>
// kernel: tile.33
= control target key start
LH: loop header
LB: loop body
LE: loop exit
PB: predicated region body
PF: predicated region fallthrough
CT: control target
= control target key end

     0   :  { %s28_s0 = inlined_call_operand.vmem [shape: f32[4], index: 0, kind: input, shape index: {}]   ;;  %s29_s1 = inlined_call_operand.vmem [shape: f32[16,4], index: 1, kind: output, shape index: {}]  }
   0x1   :  { %v4_v0 = vld [vmem:[%s28_s0] ss:$0 sm:$0xff] }
   0x2   :  { %5 = vst [vmem:[%s29_s1] sm:$0xff] %v4_v0 }
   0x3   :  { %8 = vst [vmem:[%s29_s1 + $0x8] sm:$0xff] %v4_v0 }

// kernel: tile.44
= control target key start
LH: loop header
LB: loop body
LE: loop exit
PB: predicated region body
PF: predicated region fallthrough
CT: control target
= control target key end

     0   :  { %s131_s10 = smov 60   ;;  %s132_s11 = smov 52   ;;  %vm3_vm0 = vcmask 31744   ;;  %vm9_vm1 = vcmask 523744   ;;  %vm15_vm2 = vcmask 490944   ;;  %vm21_vm3 = vcmask 458144   ;;  %s207_s0 = inlined_call_operand.vmem [shape: f32[16,4], index: 0, kind: input, shape index: {}]   ;;  %s208_s1 = inlined_call_operand.vmem [shape: f32[1,64], index: 1, kind: output, shape index: {}]  }
   0x1   :  { %v101_v0 = vld [vmem:[%s207_s0 + $0xf] sm:$0x1]   ;;  %v103_v1 = vld [vmem:[%s207_s0 + $0xd] sm:$0x1]   ;;  %v105_v2 = vld [vmem:[%s207_s0 + $0xb] sm:$0x1]  }
   0x2   :  { %7 = vrot.lane.b32.xlu0 %v101_v0, %s131_s10  ;;  %19 = vrot.lane.b32.xlu1 %v103_v1, %s132_s11  ;;  %s133_s14 = smov 44   ;;  %v102_v3 = vld [vmem:[%s207_s0 + $0xe] sm:$0x1]   ;;  %v104_v4 = vld [vmem:[%s207_s0 + $0xc] sm:$0x1]   ;;  %s134_s19 = smov 56  }
   0x3   :  { %31 = vrot.lane.b32.xlu2 %v105_v2, %s133_s14  ;;  %s135_s20 = smov 48   ;;  %v106_v5 = vld [vmem:[%s207_s0 + $0xa] sm:$0x1]   ;;  %s136_s23 = smov 40   ;;  %v107_v6 = vld [vmem:[%s207_s0 + $0x9] sm:$0x1]  }
   0x4   :  { %v108_v7 = vld [vmem:[%s207_s0 + $0x8] sm:$0x1]   ;;  %s137_s28 = smov 36   ;;  %s138_s29 = smov 32   ;;  %v109_v8 = vld [vmem:[%s207_s0 + $0x7] sm:$0x1]  }
   0x5   :  { %s139_s3 = smov 28   ;;  %v110_v9 = vld [vmem:[%s207_s0 + $0x6] sm:$0x1]   ;;  %v111_v10 = vld [vmem:[%s207_s0 + $0x5] sm:$0x1]   ;;  %s140_s8 = smov 24  }
   0x6   :  { %s141_s9 = smov 20   ;;  %v112_v11 = vld [vmem:[%s207_s0 + $0x4] sm:$0x1]   ;;  %s142_s12 = smov 16   ;;  %v113_v12 = vld [vmem:[%s207_s0 + $0x3] sm:$0x1]  }
   0x7   :  { %v114_v13 = vld [vmem:[%s207_s0 + $0x2] sm:$0x1]   ;;  %s143_s17 = smov 12   ;;  %s144_s18 = smov 8   ;;  %v115_v14 = vld [vmem:[%s207_s0 + $0x1] sm:$0x1]  }
   0x8   :  { %s145_s21 = smov 4   ;;  %v2_v15 = vld [vmem:[%s207_s0] sm:$0x1]   ;;  %vm27_vm4 = vcmask 425344   ;;  %vm33_vm5 = vcmask 392544   ;;  %vm39_vm6 = vcmask 359744  }
   0x9   :  { %4 = vst.msk [vmem:[#allocation0] sm:$0x1] %vm3_vm0, %v2_v15   ;;  %vm45_vm7 = vcmask 326944   ;;  %vm51_vm8 = vcmask 294144   ;;  %vm57_vm9 = vcmask 261344   ;;  %vm63_vm10 = vcmask 228544  }
   0xa   :  { %13 = vrot.lane.b32.xlu0 %v102_v3, %s134_s19  ;;  %25 = vrot.lane.b32.xlu1 %v104_v4, %s135_s20  ;;  %vm69_vm11 = vcmask 195744   ;;  %vm75_vm12 = vcmask 162944   ;;  %vm81_vm13 = vcmask 130144   ;;  %vm87_vm14 = vcmask 97344  }
   0xb   :  { %37 = vrot.lane.b32.xlu2 %v106_v5, %s136_s23  ;;  %vm93_vm15 = vcmask 64544  }
  0x12   :  { %43 = vrot.lane.b32.xlu0 %v107_v6, %s137_s28  ;;  %49 = vrot.lane.b32.xlu1 %v108_v7, %s138_s29 }
  0x13   :  { %55 = vrot.lane.b32.xlu2 %v109_v8, %s139_s3 }
  0x1a   :  { %61 = vrot.lane.b32.xlu0 %v110_v9, %s140_s8  ;;  %67 = vrot.lane.b32.xlu1 %v111_v10, %s141_s9 }
  0x1b   :  { %73 = vrot.lane.b32.xlu2 %v112_v11, %s142_s12 }
  0x22   :  { %79 = vrot.lane.b32.xlu0 %v113_v12, %s143_s17  ;;  %85 = vrot.lane.b32.xlu1 %v114_v13, %s144_s18 }
  0x23   :  { %91 = vrot.lane.b32.xlu2 %v115_v14, %s145_s21 }
  0x5d   :  { %v32_v16 = vpop.permute.xlu2 %31  }
  0x65   :  { %v38_v17 = vpop.permute.xlu2 %37  }
  0x6d   :  { %v56_v18 = vpop.permute.xlu2 %55  }
  0x74   :  { %v8_v19 = vpop.permute.xlu0 %7   ;;  %v20_v20 = vpop.permute.xlu1 %19  }
  0x75   :  { %10 = vst.msk [vmem:[#allocation0] sm:$0x1] %vm9_vm1, %v8_v19   ;;  %v74_v21 = vpop.permute.xlu2 %73  }
  0x7c   :  { %v14_v22 = vpop.permute.xlu0 %13   ;;  %v26_v23 = vpop.permute.xlu1 %25  }
  0x7d   :  { %16 = vst.msk [vmem:[#allocation0] sm:$0x1] %vm15_vm2, %v14_v22   ;;  %v92_v24 = vpop.permute.xlu2 %91  }
  0x7e   :  { %22 = vst.msk [vmem:[#allocation0] sm:$0x1] %vm21_vm3, %v20_v20  }
  0x7f   :  { %28 = vst.msk [vmem:[#allocation0] sm:$0x1] %vm27_vm4, %v26_v23  }
  0x80   :  { %34 = vst.msk [vmem:[#allocation0] sm:$0x1] %vm33_vm5, %v32_v16  }
  0x81   :  { %40 = vst.msk [vmem:[#allocation0] sm:$0x1] %vm39_vm6, %v38_v17  }
  0x84   :  { %v44_v25 = vpop.permute.xlu0 %43   ;;  %v50_v26 = vpop.permute.xlu1 %49  }
  0x85   :  { %46 = vst.msk [vmem:[#allocation0] sm:$0x1] %vm45_vm7, %v44_v25  }
  0x86   :  { %52 = vst.msk [vmem:[#allocation0] sm:$0x1] %vm51_vm8, %v50_v26  }
  0x87   :  { %58 = vst.msk [vmem:[#allocation0] sm:$0x1] %vm57_vm9, %v56_v18  }
  0x8c   :  { %v62_v27 = vpop.permute.xlu0 %61   ;;  %v68_v28 = vpop.permute.xlu1 %67  }
  0x8d   :  { %64 = vst.msk [vmem:[#allocation0] sm:$0x1] %vm63_vm10, %v62_v27  }
  0x8e   :  { %70 = vst.msk [vmem:[#allocation0] sm:$0x1] %vm69_vm11, %v68_v28  }
  0x8f   :  { %76 = vst.msk [vmem:[#allocation0] sm:$0x1] %vm75_vm12, %v74_v21  }
  0x94   :  { %v80_v29 = vpop.permute.xlu0 %79   ;;  %v86_v30 = vpop.permute.xlu1 %85  }
  0x95   :  { %82 = vst.msk [vmem:[#allocation0] sm:$0x1] %vm81_vm13, %v80_v29  }
  0x96   :  { %88 = vst.msk [vmem:[#allocation0] sm:$0x1] %vm87_vm14, %v86_v30  }
  0x97   :  { %94 = vst.msk [vmem:[#allocation0] sm:$0x1] %vm93_vm15, %v92_v24  }
  0x9e   :  { %v97_v31 = vld [vmem:[#allocation0] sm:$0x1] }
  0x9f   :  { %100 = vst [vmem:[%s208_s1] sm:$0x1] %v97_v31 }

// kernel: tile.34
= control target key start
LH: loop header
LB: loop body
LE: loop exit
PB: predicated region body
PF: predicated region fallthrough
CT: control target
= control target key end

     0   :  { %s131_s10 = smov 60   ;;  %s132_s11 = smov 52   ;;  %vm3_vm0 = vcmask 31744   ;;  %vm9_vm1 = vcmask 523744   ;;  %vm15_vm2 = vcmask 490944   ;;  %vm21_vm3 = vcmask 458144   ;;  %s207_s0 = inlined_call_operand.vmem [shape: f32[16,4], index: 0, kind: input, shape index: {}]   ;;  %s208_s1 = inlined_call_operand.vmem [shape: f32[64], index: 1, kind: output, shape index: {}]  }
   0x1   :  { %v101_v0 = vld [vmem:[%s207_s0 + $0xf] sm:$0x1]   ;;  %v103_v1 = vld [vmem:[%s207_s0 + $0xd] sm:$0x1]   ;;  %v105_v2 = vld [vmem:[%s207_s0 + $0xb] sm:$0x1]  }
   0x2   :  { %7 = vrot.lane.b32.xlu0 %v101_v0, %s131_s10  ;;  %19 = vrot.lane.b32.xlu1 %v103_v1, %s132_s11  ;;  %s133_s14 = smov 44   ;;  %v102_v3 = vld [vmem:[%s207_s0 + $0xe] sm:$0x1]   ;;  %v104_v4 = vld [vmem:[%s207_s0 + $0xc] sm:$0x1]   ;;  %s134_s19 = smov 56  }
   0x3   :  { %31 = vrot.lane.b32.xlu2 %v105_v2, %s133_s14  ;;  %s135_s20 = smov 48   ;;  %v106_v5 = vld [vmem:[%s207_s0 + $0xa] sm:$0x1]   ;;  %s136_s23 = smov 40   ;;  %v107_v6 = vld [vmem:[%s207_s0 + $0x9] sm:$0x1]  }
   0x4   :  { %v108_v7 = vld [vmem:[%s207_s0 + $0x8] sm:$0x1]   ;;  %s137_s28 = smov 36   ;;  %s138_s29 = smov 32   ;;  %v109_v8 = vld [vmem:[%s207_s0 + $0x7] sm:$0x1]  }
   0x5   :  { %s139_s3 = smov 28   ;;  %v110_v9 = vld [vmem:[%s207_s0 + $0x6] sm:$0x1]   ;;  %v111_v10 = vld [vmem:[%s207_s0 + $0x5] sm:$0x1]   ;;  %s140_s8 = smov 24  }
   0x6   :  { %s141_s9 = smov 20   ;;  %v112_v11 = vld [vmem:[%s207_s0 + $0x4] sm:$0x1]   ;;  %s142_s12 = smov 16   ;;  %v113_v12 = vld [vmem:[%s207_s0 + $0x3] sm:$0x1]  }
   0x7   :  { %v114_v13 = vld [vmem:[%s207_s0 + $0x2] sm:$0x1]   ;;  %s143_s17 = smov 12   ;;  %s144_s18 = smov 8   ;;  %v115_v14 = vld [vmem:[%s207_s0 + $0x1] sm:$0x1]  }
   0x8   :  { %s145_s21 = smov 4   ;;  %v2_v15 = vld [vmem:[%s207_s0] sm:$0x1]   ;;  %vm27_vm4 = vcmask 425344   ;;  %vm33_vm5 = vcmask 392544   ;;  %vm39_vm6 = vcmask 359744  }
   0x9   :  { %4 = vst.msk [vmem:[#allocation0] sm:$0x1] %vm3_vm0, %v2_v15   ;;  %vm45_vm7 = vcmask 326944   ;;  %vm51_vm8 = vcmask 294144   ;;  %vm57_vm9 = vcmask 261344   ;;  %vm63_vm10 = vcmask 228544  }
   0xa   :  { %13 = vrot.lane.b32.xlu0 %v102_v3, %s134_s19  ;;  %25 = vrot.lane.b32.xlu1 %v104_v4, %s135_s20  ;;  %vm69_vm11 = vcmask 195744   ;;  %vm75_vm12 = vcmask 162944   ;;  %vm81_vm13 = vcmask 130144   ;;  %vm87_vm14 = vcmask 97344  }
   0xb   :  { %37 = vrot.lane.b32.xlu2 %v106_v5, %s136_s23  ;;  %vm93_vm15 = vcmask 64544  }
  0x12   :  { %43 = vrot.lane.b32.xlu0 %v107_v6, %s137_s28  ;;  %49 = vrot.lane.b32.xlu1 %v108_v7, %s138_s29 }
  0x13   :  { %55 = vrot.lane.b32.xlu2 %v109_v8, %s139_s3 }
  0x1a   :  { %61 = vrot.lane.b32.xlu0 %v110_v9, %s140_s8  ;;  %67 = vrot.lane.b32.xlu1 %v111_v10, %s141_s9 }
  0x1b   :  { %73 = vrot.lane.b32.xlu2 %v112_v11, %s142_s12 }
  0x22   :  { %79 = vrot.lane.b32.xlu0 %v113_v12, %s143_s17  ;;  %85 = vrot.lane.b32.xlu1 %v114_v13, %s144_s18 }
  0x23   :  { %91 = vrot.lane.b32.xlu2 %v115_v14, %s145_s21 }
  0x5d   :  { %v32_v16 = vpop.permute.xlu2 %31  }
  0x65   :  { %v38_v17 = vpop.permute.xlu2 %37  }
  0x6d   :  { %v56_v18 = vpop.permute.xlu2 %55  }
  0x74   :  { %v8_v19 = vpop.permute.xlu0 %7   ;;  %v20_v20 = vpop.permute.xlu1 %19  }
  0x75   :  { %10 = vst.msk [vmem:[#allocation0] sm:$0x1] %vm9_vm1, %v8_v19   ;;  %v74_v21 = vpop.permute.xlu2 %73  }
  0x7c   :  { %v14_v22 = vpop.permute.xlu0 %13   ;;  %v26_v23 = vpop.permute.xlu1 %25  }
  0x7d   :  { %16 = vst.msk [vmem:[#allocation0] sm:$0x1] %vm15_vm2, %v14_v22   ;;  %v92_v24 = vpop.permute.xlu2 %91  }
  0x7e   :  { %22 = vst.msk [vmem:[#allocation0] sm:$0x1] %vm21_vm3, %v20_v20  }
  0x7f   :  { %28 = vst.msk [vmem:[#allocation0] sm:$0x1] %vm27_vm4, %v26_v23  }
  0x80   :  { %34 = vst.msk [vmem:[#allocation0] sm:$0x1] %vm33_vm5, %v32_v16  }
  0x81   :  { %40 = vst.msk [vmem:[#allocation0] sm:$0x1] %vm39_vm6, %v38_v17  }
  0x84   :  { %v44_v25 = vpop.permute.xlu0 %43   ;;  %v50_v26 = vpop.permute.xlu1 %49  }
  0x85   :  { %46 = vst.msk [vmem:[#allocation0] sm:$0x1] %vm45_vm7, %v44_v25  }
  0x86   :  { %52 = vst.msk [vmem:[#allocation0] sm:$0x1] %vm51_vm8, %v50_v26  }
  0x87   :  { %58 = vst.msk [vmem:[#allocation0] sm:$0x1] %vm57_vm9, %v56_v18  }
  0x8c   :  { %v62_v27 = vpop.permute.xlu0 %61   ;;  %v68_v28 = vpop.permute.xlu1 %67  }
  0x8d   :  { %64 = vst.msk [vmem:[#allocation0] sm:$0x1] %vm63_vm10, %v62_v27  }
  0x8e   :  { %70 = vst.msk [vmem:[#allocation0] sm:$0x1] %vm69_vm11, %v68_v28  }
  0x8f   :  { %76 = vst.msk [vmem:[#allocation0] sm:$0x1] %vm75_vm12, %v74_v21  }
  0x94   :  { %v80_v29 = vpop.permute.xlu0 %79   ;;  %v86_v30 = vpop.permute.xlu1 %85  }
  0x95   :  { %82 = vst.msk [vmem:[#allocation0] sm:$0x1] %vm81_vm13, %v80_v29  }
  0x96   :  { %88 = vst.msk [vmem:[#allocation0] sm:$0x1] %vm87_vm14, %v86_v30  }
  0x97   :  { %94 = vst.msk [vmem:[#allocation0] sm:$0x1] %vm93_vm15, %v92_v24  }
  0x9e   :  { %v97_v31 = vld [vmem:[#allocation0] sm:$0x1] }
  0x9f   :  { %100 = vst [vmem:[%s208_s1] sm:$0x1] %v97_v31 }

// kernel: inception_nd_v3_forward.1
= control target key start
LH: loop header
LB: loop body
LE: loop exit
PB: predicated region body
PF: predicated region fallthrough
CT: control target
= control target key end

     0   :  { %s1135_s24 = smov 0   ;;  %s1452_s0 = inlined_call_operand.vmem [shape: f32[2,16,64], index: 0, kind: input, shape index: {}]   ;;  %s1453_s1 = inlined_call_operand.vmem [shape: bf16[192,192], index: 1, kind: input, shape index: {}]   ;;  %s1454_s2 = inlined_call_operand.vmem [shape: f32[1,192], index: 2, kind: input, shape index: {}]   ;;  %s1455_s3 = inlined_call_operand.vmem [shape: bf16[192,64], index: 3, kind: input, shape index: {}]   ;;  %s1456_s4 = inlined_call_operand.vmem [shape: f32[1,64], index: 4, kind: input, shape index: {}]   ;;  %s1457_s5 = inlined_call_operand.vmem [shape: f32[64,64], index: 5, kind: input, shape index: {}]   ;;  %s1458_s6 = inlined_call_operand.vmem [shape: f32[1,64], index: 6, kind: input, shape index: {}]   ;;  %s1459_s7 = inlined_call_operand.vmem [shape: f32[2,16,256], index: 7, kind: output, shape index: {}]  }
   0x1 LB: > { %s855_s25 = sadd.s32 4294967295, %s1090_s24   ;;  %p859_p0 = scmp.ge.s32.totalorder %s1090_s24, 1  ;;  %s1090_s24 = sphi %s1135_s24, %s17_s24  }
   0x2   : > { %p237_p1 = scmp.lt.s32.totalorder %s1090_s24, 3 }
   0x4   : > { %p238_p2 = pnand %p859_p0, %p237_p1 }
   0x5   : > { %p269_p3 = scmp.lt.s32.totalorder (!%p238_p2), %s855_s25, 1  ;;  %s1093_s29 = smov (!%p238_p2), 4  }
   0x6   : > { %241 = sbr.rel (%p238_p2) target bundleno = 527 (0x20f), region = 48  ;;  %s1094_s8 = smov (!%p238_p2), 64  }
   0xb   : > { %v922_v0 = vld [vmem:[%s1453_s1 + $0x70] sm:$0xf]  ;;  %v1032_v1 = vld [vmem:[%s1453_s1 + $0x74] sm:$0xf0]  ;;  %v1031_v2 = vld [vmem:[%s1453_s1 + $0x74] sm:$0xf] }
   0xc   : > { %v924_v3 = vld [vmem:[%s1453_s1 + $0x78] sm:$0xf0]  ;;  %s1461_s25 = smov (!%p269_p3, %s855_s25), 1  ;;  %v923_v4 = vor.u32 %v1032_v1, %v922_v0  ;;  %v914_v6 = vld [vmem:[%s1453_s1 + $0x60] sm:$0xf]  ;;  %vm286_vm0 = vcmask 1040384  }
   0xd   : > { %v927_v5 = vor.u32 %v1031_v2, %v924_v3  ;;  %v1030_v7 = vld [vmem:[%s1453_s1 + $0x64] sm:$0xf0]  ;;  %v1029_v8 = vld [vmem:[%s1453_s1 + $0x64] sm:$0xf]  ;;  %v916_v9 = vld [vmem:[%s1453_s1 + $0x68] sm:$0xf0] }
   0xe   : > { %s1015_s19 = sshll.u32 %s1461_s25, 4  ;;  %469 = vmatpush.bf16.msra.mxu0 %v923_v4  ;;  %v915_v10 = vor.u32 %v1030_v7, %v914_v6  ;;  %v919_v11 = vor.u32 %v1029_v8, %v916_v9  ;;  %v906_v12 = vld [vmem:[%s1453_s1 + $0x50] sm:$0xf]  ;;  %v1028_v13 = vld [vmem:[%s1453_s1 + $0x54] sm:$0xf0]  ;;  %vm293_vm1 = vcmask 1046528  }
   0xf   : > { %497 = vmatpush.bf16.msra.mxu2 %v927_v5  ;;  %s273_s28 = scalar_lea.vmem %s1452_s0, %s1015_s19  ;;  %v1027_v14 = vld [vmem:[%s1453_s1 + $0x54] sm:$0xf]  ;;  %v908_v15 = vld [vmem:[%s1453_s1 + $0x58] sm:$0xf0]  ;;  %v954_v16 = vld [vmem:[%s1453_s1 + $0xb0] sm:$0xf]  ;;  %v907_v24 = vor.u32 %v1028_v13, %v906_v12 }
  0x10   : > { %v280_v17 = vld [vmem:[%s273_s28] sm:$0xff]  ;;  %v281_v18 = vld [vmem:[%s273_s28 + $0x8] sm:$0xff]  ;;  %v1040_v19 = vld [vmem:[%s1453_s1 + $0xb4] sm:$0xf0]  ;;  %v911_v25 = vor.u32 %v1027_v14, %v908_v15  ;;  %s1092_s28 = smov 124   ;;  %vm304_vm2 = vcmask 1045504  }
  0x11   : > { %v283_v20 = vrot.slane %v281_v18, 7  ;;  %v1191_v21 = vrot.slane %v280_v17, 7  ;;  %v955_v22 = vor.u32 %v1040_v19, %v954_v16  ;;  %v898_v23 = vld [vmem:[%s1453_s1 + $0x40] sm:$0xf]  ;;  %v1026_v26 = vld [vmem:[%s1453_s1 + $0x44] sm:$0xf0] }
  0x12   : > { %470 = vmatpush.bf16.msra.mxu0 %v915_v10  ;;  %v1025_v27 = vld [vmem:[%s1453_s1 + $0x44] sm:$0xf]  ;;  %v946_v28 = vld [vmem:[%s1453_s1 + $0xa0] sm:$0xf]  ;;  %v900_v32 = vld [vmem:[%s1453_s1 + $0x48] sm:$0xf0]  ;;  %v899_v37 = vor.u32 %v1026_v26, %v898_v23 }
  0x13   : > { %498 = vmatpush.bf16.msra.mxu2 %v919_v11  ;;  %v1207_v29 = vsel %vm286_vm0, %v1191_v21, %v283_v20  ;;  %v1211_v30 = vsel %vm286_vm0, %v283_v20, %v1191_v21  ;;  %v1214_v31 = vsel %vm286_vm0, %v283_v20, -3.4028235e+38  ;;  %487 = vmatpush.bf16.msra.mxu1 %v955_v22  ;;  %v1038_v33 = vld [vmem:[%s1453_s1 + $0xa4] sm:$0xf0]  ;;  %v938_v38 = vld [vmem:[%s1453_s1 + $0x90] sm:$0xf]  ;;  %v903_v42 = vor.u32 %v1025_v27, %v900_v32 }
  0x14   : > { %v294_v34 = vrot.slane %v1211_v30, 1  ;;  %v295_v35 = vrot.slane %v1207_v29, 1  ;;  %694 = vrot.lane.b32.xlu1 %v1214_v31, %s1092_s28  ;;  %v947_v36 = vor.u32 %v1038_v33, %v946_v28  ;;  %707 = vrot.lane.b32.xlu2 %v1214_v31, %s1093_s29  ;;  %v1036_v39 = vld [vmem:[%s1453_s1 + $0x94] sm:$0xf0]  ;;  %v890_v43 = vld [vmem:[%s1453_s1 + $0x30] sm:$0xf] }
  0x15   : > { %v1039_v44 = vld [vmem:[%s1453_s1 + $0xb4] sm:$0xf]  ;;  %v956_v45 = vld [vmem:[%s1453_s1 + $0xb8] sm:$0xf0]  ;;  %v1024_v47 = vld [vmem:[%s1453_s1 + $0x34] sm:$0xf0]  ;;  %v939_v50 = vor.u32 %v1036_v39, %v938_v38 }
  0x16   : > { %v296_v40 = vsel %vm293_vm1, %v294_v34, %v295_v35  ;;  %v297_v41 = vsel %vm293_vm1, %v295_v35, %v294_v34  ;;  %471 = vmatpush.bf16.msra.mxu0 %v907_v24  ;;  %v1023_v48 = vld [vmem:[%s1453_s1 + $0x34] sm:$0xf]  ;;  %v892_v49 = vld [vmem:[%s1453_s1 + $0x38] sm:$0xf0]  ;;  %v959_v51 = vor.u32 %v1039_v44, %v956_v45  ;;  %v930_v52 = vld [vmem:[%s1453_s1 + $0x80] sm:$0xf]  ;;  %v891_v57 = vor.u32 %v1024_v47, %v890_v43 }
  0x17   : > { %499 = vmatpush.bf16.msra.mxu2 %v911_v25  ;;  %v1072_v46 = vpack.i.bf16 %v297_v41, %v296_v40  ;;  %488 = vmatpush.bf16.msra.mxu1 %v947_v36  ;;  %v1034_v53 = vld [vmem:[%s1453_s1 + $0x84] sm:$0xf0]  ;;  %v882_v54 = vld [vmem:[%s1453_s1 + $0x20] sm:$0xf]  ;;  %v1037_v55 = vld [vmem:[%s1453_s1 + $0xa4] sm:$0xf]  ;;  %v895_v58 = vor.u32 %v1023_v48, %v892_v49 }
  0x18   : > { %515 = vmatpush.bf16.msra.mxu3 %v959_v51  ;;  %v948_v56 = vld [vmem:[%s1453_s1 + $0xa8] sm:$0xf0]  ;;  %v1022_v59 = vld [vmem:[%s1453_s1 + $0x24] sm:$0xf0]  ;;  %v1021_v60 = vld [vmem:[%s1453_s1 + $0x24] sm:$0xf]  ;;  %v931_v63 = vor.u32 %v1034_v53, %v930_v52 }
  0x19   : > { %1073 = vrot.lane.b32.xlu0 %v1072_v46, %s1094_s8  ;;  %v884_v61 = vld [vmem:[%s1453_s1 + $0x28] sm:$0xf0]  ;;  %v951_v62 = vor.u32 %v1037_v55, %v948_v56  ;;  %v305_v0 = vrot.slane %v1211_v30, 2  ;;  %v306_v1 = vrot.slane %v1207_v29, 2  ;;  %v883_v4 = vor.u32 %v1022_v59, %v882_v54  ;;  %v874_v6 = vld [vmem:[%s1453_s1 + $0x10] sm:$0xf] }
  0x1a   : > { %472 = vmatpush.bf16.msra.mxu0 %v899_v37  ;;  %v887_v5 = vor.u32 %v1021_v60, %v884_v61  ;;  %v1020_v7 = vld [vmem:[%s1453_s1 + $0x14] sm:$0xf0]  ;;  %v1019_v8 = vld [vmem:[%s1453_s1 + $0x14] sm:$0xf]  ;;  %v876_v9 = vld [vmem:[%s1453_s1 + $0x18] sm:$0xf0] }
  0x1b   : > { %500 = vmatpush.bf16.msra.mxu2 %v903_v42  ;;  %489 = vmatpush.bf16.msra.mxu1 %v939_v50  ;;  %v307_v2 = vsel %vm304_vm2, %v305_v0, %v306_v1  ;;  %v308_v3 = vsel %vm304_vm2, %v306_v1, %v305_v0  ;;  %vm311_vm3 = vcmask 523264   ;;  %v1301_v11 = vsel %vm286_vm0, -3.4028235e+38, %v1191_v21  ;;  %v1035_v14 = vld [vmem:[%s1453_s1 + $0x94] sm:$0xf]  ;;  %v750_v26 = vld [vmem:[%s1457_s5 + $0x38] sm:$0xff] }
  0x1c   : > { %705 = vrot.lane.b32.xlu1 %v1207_v29, %s1093_s29  ;;  %516 = vmatpush.bf16.msra.mxu3 %v951_v62  ;;  %v315_v10 = vpack.c.bf16 %v308_v3, %v307_v2  ;;  %v875_v12 = vor.u32 %v1020_v7, %v874_v6  ;;  %v879_v13 = vor.u32 %v1019_v8, %v876_v9  ;;  %v940_v15 = vld [vmem:[%s1453_s1 + $0x98] sm:$0xf0]  ;;  %v866_v17 = vld [vmem:[%s1453_s1] sm:$0xf]  ;;  %v1018_v18 = vld [vmem:[%s1453_s1 + $0x4] sm:$0xf0] }
  0x1d   : > { %v943_v16 = vor.u32 %v1035_v14, %v940_v15  ;;  %v1017_v19 = vld [vmem:[%s1453_s1 + $0x4] sm:$0xf]  ;;  %v867_v20 = vor.u32 %v1018_v18, %v866_v17  ;;  %v868_v21 = vld [vmem:[%s1453_s1 + $0x8] sm:$0xf0]  ;;  %v749_v27 = vld [vmem:[%s1457_s5 + $0x30] sm:$0xff]  ;;  %vm712_vm4 = vcmask 31744  }
  0x1e   : > { %473 = vmatpush.bf16.msra.mxu0 %v891_v57  ;;  %v1033_v22 = vld [vmem:[%s1453_s1 + $0x84] sm:$0xf]  ;;  %v932_v23 = vld [vmem:[%s1453_s1 + $0x88] sm:$0xf0]  ;;  %v871_v24 = vor.u32 %v1017_v19, %v868_v21  ;;  %vm699_vm5 = vcmask 490496   ;;  %v746_v36 = vld [vmem:[%s1457_s5 + $0x18] sm:$0xff] }
  0x1f   : > { %501 = vmatpush.bf16.msra.mxu2 %v895_v58  ;;  %490 = vmatpush.bf16.msra.mxu1 %v931_v63  ;;  %v935_v25 = vor.u32 %v1033_v22, %v932_v23  ;;  %v748_v28 = vld [vmem:[%s1457_s5 + $0x28] sm:$0xff]  ;;  %v747_v32 = vld [vmem:[%s1457_s5 + $0x20] sm:$0xff]  ;;  %v745_v38 = vld [vmem:[%s1457_s5 + $0x10] sm:$0xff]  ;;  %s1016_s11 = sshll.u32 %s1461_s25, 5 }
  0x20   : > { %517 = vmatpush.bf16.msra.mxu3 %v943_v16  ;;  %v744_v40 = vld [vmem:[%s1457_s5 + $0x8] sm:$0xff]  ;;  %v743_v44 = vld [vmem:[%s1457_s5] sm:$0xff]  ;;  %v1052_v8 = vld [vmem:[%s1455_s3 + $0x58] sm:$0xff]  ;;  %s278_s13 = scalar_lea.vmem %s1459_s7, %s1016_s11 }
  0x21   : > { %692 = vrot.lane.b32.xlu0 %v1207_v29, %s1092_s28  ;;  %v1051_v9 = vld [vmem:[%s1455_s3 + $0x50] sm:$0xff]  ;;  %v1046_v18 = vld [vmem:[%s1455_s3 + $0x28] sm:$0xff]  ;;  %v1045_v22 = vld [vmem:[%s1455_s3 + $0x20] sm:$0xff] }
  0x22   : > { %474 = vmatpush.bf16.msra.mxu0 %v883_v4  ;;  %960 = vmatmul.msk.bf16.vlgmr.msra.gmra.mxu1 %vm311_vm3, %v315_v10  ;;  %v1047_v14 = vld [vmem:[%s1455_s3 + $0x30] sm:$0xff] }
  0x23   : > { %502 = vmatpush.bf16.msra.mxu2 %v887_v5 }
  0x24   : > { %703 = vrot.lane.b32.xlu1 %v1301_v11, %s1093_s29  ;;  %518 = vmatpush.bf16.msra.mxu3 %v935_v25 }
  0x26   : > { %475 = vmatpush.bf16.msra.mxu0 %v875_v12  ;;  %v1048_v12 = vld [vmem:[%s1455_s3 + $0x38] sm:$0xff] }
  0x27   : > { %503 = vmatpush.bf16.msra.mxu2 %v879_v13  ;;  %961 = vmatmul.msk.bf16.vlgmr.msra.gmra.mxu3 %vm311_vm3, %v315_v10  ;;  %v1050_v10 = vld [vmem:[%s1455_s3 + $0x48] sm:$0xff]  ;;  %v340_v13 = vld [vmem:[%s1454_s2] sm:$0x3] }
  0x28   : > { %676 = vmatpush.bf16.msrb.mxu3 %v1052_v8  ;;  %658 = vmatpush.bf16.msrb.mxu1 %v1048_v12  ;;  %v342_v17 = vperm.slane %v340_v13, 0 }
  0x29   : > { %690 = vrot.lane.b32.xlu0 %v1301_v11, %s1092_s28 }
  0x2a   : > { %476 = vmatpush.bf16.msra.mxu0 %v867_v20 }
  0x2b   : > { %504 = vmatpush.bf16.msra.mxu2 %v871_v24 }
  0x2c   : > { %677 = vmatpush.bf16.msrb.mxu3 %v1051_v9  ;;  %659 = vmatpush.bf16.msrb.mxu1 %v1047_v14 }
  0x2e   : > { %769 = vmatpush.msrb.mxu0 %v750_v26 }
  0x2f   : > { %1053 = vmatpush.msrb.mxu2 %v750_v26 }
  0x30   : > { %770 = vmatpush.msrb.mxu0 %v749_v27  ;;  %678 = vmatpush.bf16.msrb.mxu3 %v1050_v10 }
  0x31   : > { %1054 = vmatpush.msrb.mxu2 %v749_v27  ;;  %660 = vmatpush.bf16.msrb.mxu1 %v1046_v18 }
  0x32   : > { %771 = vmatpush.msrb.mxu0 %v748_v28 }
  0x33   : > { %1055 = vmatpush.msrb.mxu2 %v748_v28  ;;  %v1044_v28 = vld [vmem:[%s1455_s3 + $0x18] sm:$0xff] }
  0x34   : > { %772 = vmatpush.msrb.mxu0 %v747_v32 }
  0x35   : > { %1056 = vmatpush.msrb.mxu2 %v747_v32  ;;  %661 = vmatpush.bf16.msrb.mxu1 %v1045_v22 }
  0x36   : > { %773 = vmatpush.msrb.mxu0 %v746_v36 }
  0x37   : > { %1057 = vmatpush.msrb.mxu2 %v746_v36 }
  0x38   : > { %774 = vmatpush.msrb.mxu0 %v745_v38 }
  0x39   : > { %1058 = vmatpush.msrb.mxu2 %v745_v38  ;;  %662 = vmatpush.bf16.msrb.mxu1 %v1044_v28 }
  0x3a   : > { %775 = vmatpush.msrb.mxu0 %v744_v40 }
  0x3b   : > { %1059 = vmatpush.msrb.mxu2 %v744_v40  ;;  %v1043_v40 = vld [vmem:[%s1455_s3 + $0x10] sm:$0xff] }
  0x3c   : > { %776 = vmatpush.msrb.mxu0 %v743_v44 }
  0x3d   : > { %1060 = vmatpush.msrb.mxu2 %v743_v44  ;;  %663 = vmatpush.bf16.msrb.mxu1 %v1043_v40 }
  0x6e   : > { %v708_v33 = vpop.permute.xlu2 %707 }
  0x6f   : > { %v715_v34 = vsel %vm712_vm4, -3.4028235e+38, %v708_v33  ;;  %v343_v33 = vperm.slane %v340_v13, 1 }
  0x86   : > { %v695_v35 = vpop.permute.xlu1 %694 }
  0x87   : > { %v702_v37 = vsel %vm699_vm5, %v695_v35, -3.4028235e+38 }
  0x88   : > { %v718_v39 = vmax.f32 %v702_v37, %v715_v34 }
  0x8a   : > { %v721_v51 = vmax.f32 %v718_v39, %v1214_v31 }
  0x8b   : > { %v1074_v41 = vpop.permute.xlu0 %1073 }
  0x8c   : > { %v1076_v42 = vunpack.i.h.bf16 %v1074_v41  ;;  %v1075_v43 = vunpack.i.l.bf16 %v1074_v41  ;;  %v728_v55 = vrot.slane %v721_v51, 1  ;;  %v737_v4 = vrot.slane %v721_v51, 2 }
  0x8e   : > { %v312_v45 = vsel %vm311_vm3, %v1211_v30, %v1075_v43  ;;  %v313_v46 = vsel %vm311_vm3, %v1207_v29, %v1076_v42  ;;  %v706_v47 = vpop.permute.xlu1 %705 }
  0x8f   : > { %v314_v48 = vpack.c.bf16 %v313_v46, %v312_v45  ;;  %v714_v49 = vsel %vm712_vm4, -3.4028235e+38, %v706_v47 }
  0x91   : > { %477 = vmatmul.bf16.vlgmr.msra.gmra.mxu0 %v314_v48  ;;  %505 = vmatmul.bf16.vlgmr.msra.gmra.mxu2 %v314_v48 }
  0x93   : > { %v693_v50 = vpop.permute.xlu0 %692 }
  0x94   : > { %v701_v52 = vsel %vm699_vm5, %v693_v50, -3.4028235e+38 }
  0x95   : > { %v717_v53 = vmax.f32 %v701_v52, %v714_v49  ;;  %v1042_v52 = vld [vmem:[%s1455_s3 + $0x8] sm:$0xff] }
  0x96   : > { %v704_v30 = vpop.permute.xlu1 %703  ;;  %664 = vmatpush.bf16.msrb.mxu1 %v1042_v52 }
  0x97   : > { %v720_v54 = vmax.f32 %v717_v53, %v1207_v29  ;;  %v713_v57 = vsel %vm712_vm4, -3.4028235e+38, %v704_v30  ;;  %v1041_v30 = vld [vmem:[%s1455_s3] sm:$0xff] }
  0x99   : > { %v726_v56 = vrot.slane %v720_v54, 1  ;;  %v735_v62 = vrot.slane %v720_v54, 2 }
  0x9a   : > { %665 = vmatpush.bf16.msrb.mxu1 %v1041_v30 }
  0x9b   : > { %v691_v58 = vpop.permute.xlu0 %690  ;;  %v729_v59 = vsel %vm293_vm1, %v726_v56, %v728_v55  ;;  %v738_v6 = vsel %vm304_vm2, %v735_v62, %v737_v4  ;;  %v1083_v4 = vld [vmem:[%s1456_s4] ss:$0 sm:$0xff] }
  0x9c   : > { %v700_v60 = vsel %vm699_vm5, %v691_v58, -3.4028235e+38  ;;  %v733_v5 = vmax.f32 %v720_v54, %v729_v59  ;;  %v1082_v58 = vld [vmem:[%s1458_s6] ss:$0 sm:$0xff] }
  0x9d   : > { %v716_v61 = vmax.f32 %v700_v60, %v713_v57 }
  0x9e   : > { %v742_v7 = vmax.f32 %v733_v5, %v738_v6 }
  0x9f   : > { %v719_v63 = vmax.f32 %v716_v61, %v1301_v11  ;;  %v1049_v11 = vld [vmem:[%s1455_s3 + $0x40] sm:$0xff]  ;;  %v492_v15 = vpop.f32.mrf.mxu1 }
  0xa0   : > { %679 = vmatpush.bf16.msrb.mxu3 %v1049_v11 }
  0xa1   : > { %v725_v31 = vrot.slane %v719_v63, 1  ;;  %v734_v0 = vrot.slane %v719_v63, 2  ;;  %1012 = vmatmul.msk.f32.vlgmr.msrb.gmra.mxu2 %vm311_vm3, %v742_v7 }
  0xa3   : > { %v727_v1 = vsel %vm293_vm1, %v725_v31, %v726_v56  ;;  %v736_v29 = vsel %vm304_vm2, %v734_v0, %v735_v62 }
  0xa4   : > { %v732_v2 = vmax.f32 %v719_v63, %v727_v1 }
  0xa6   : > { %v741_v3 = vmax.f32 %v732_v2, %v736_v29 }
  0xa7   : > { %v494_v26 = vpop.f32.mrf.mxu1 }
  0xa8   : > { %1011 = vmatmul.msk.f32.vlgmr.msrb.gmra.mxu0 %vm311_vm3, %v741_v3 }
  0xaa   : > { %v520_v19 = vpop.f32.mrf.mxu3 }
  0xb2   : > { %v522_v36 = vpop.f32.mrf.mxu3 }
 0x10e   : > { %v478_v16 = vpop.f32.mrf.mxu0 }
 0x10f   : > { %v479_v20 = vadd.f32 %v478_v16, %v342_v17 }
 0x111   : > { %v1403_v24 = vadd.f32 %v492_v15, %v479_v20 }
 0x113   : > { %v529_v32 = vrot.slane %v1403_v24, 7 }
 0x114   : > { %v506_v21 = vpop.f32.mrf.mxu2 }
 0x115   : > { %v507_v53 = vadd.f32 %v506_v21, %v343_v33 }
 0x116   : > { %v480_v23 = vpop.f32.mrf.mxu0 }
 0x117   : > { %v481_v25 = vadd.f32 %v480_v23, %v342_v17  ;;  %v521_v54 = vadd.f32 %v520_v19, %v507_v53 }
 0x119   : > { %v1405_v27 = vadd.f32 %v494_v26, %v481_v25 }
 0x11b   : > { %v526_v34 = vrot.slane %v1405_v27, 7 }
 0x11c   : > { %v508_v35 = vpop.f32.mrf.mxu2 }
 0x11d   : > { %v530_v37 = vsel %vm286_vm0, %v529_v32, %v526_v34  ;;  %v533_v38 = vsel %vm286_vm0, %v526_v34, %v529_v32  ;;  %v509_v39 = vadd.f32 %v508_v35, %v343_v33 }
 0x11e   : > { %v545_v41 = vrot.slane %v533_v38, 2  ;;  %v546_v42 = vrot.slane %v530_v37, 2  ;;  %v535_v43 = vrot.slane %v533_v38, 1  ;;  %v536_v44 = vrot.slane %v530_v37, 1 }
 0x11f   : > { %v523_v45 = vadd.f32 %v522_v36, %v509_v39 }
 0x120   : > { %v547_v46 = vsel %vm304_vm2, %v545_v41, %v546_v42  ;;  %v548_v47 = vsel %vm304_vm2, %v546_v42, %v545_v41  ;;  %v537_v48 = vsel %vm293_vm1, %v535_v43, %v536_v44  ;;  %v538_v49 = vsel %vm293_vm1, %v536_v44, %v535_v43 }
 0x121   : > { %788 = vrot.lane.b32.xlu0 %v523_v45, %s1094_s8  ;;  %v554_v50 = vpack.c.bf16 %v548_v47, %v547_v46  ;;  %v1077_v51 = vpack.i.bf16 %v538_v49, %v537_v48 }
 0x123   : > { %1010 = vmatmul.msk.bf16.vlgmr.msrb.gmra.mxu3 %vm311_vm3, %v554_v50  ;;  %1078 = vrot.lane.b32.xlu2 %v1077_v51, %s1094_s8 }
 0x124   : > { %v781_v1 = vpop.f32.mrf.mxu2 }
 0x125   : > { %v778_v59 = vpop.f32.mrf.mxu0  ;;  %v782_v29 = vadd.f32 %v1082_v58, %v781_v1 }
 0x126   : > { %v779_v63 = vadd.f32 %v1082_v58, %v778_v59 }
 0x12b   : > { %786 = vrot.lane.b32.xlu2 %v521_v54, %s1094_s8 }
 0x17d   : > { %v1079_v55 = vpop.permute.xlu2 %1078 }
 0x17e   : > { %v1081_v56 = vunpack.i.h.bf16 %v1079_v55  ;;  %v1080_v57 = vunpack.i.l.bf16 %v1079_v55 }
 0x180   : > { %v551_v60 = vsel %vm311_vm3, %v533_v38, %v1080_v57  ;;  %v552_v61 = vsel %vm311_vm3, %v530_v37, %v1081_v56 }
 0x181   : > { %v553_v62 = vpack.c.bf16 %v552_v61, %v551_v60 }
 0x183   : > { %666 = vmatmul.bf16.vlgmr.msrb.gmra.mxu1 %v553_v62 }
 0x185   : > { %v787_v31 = vpop.permute.xlu2 %786 }
 0x186   : > { %v794_v0 = vsel %vm311_vm3, %v779_v63, %v787_v31 }
 0x187   : > { %797 = vst [vmem:[%s278_s13 + $0x8] sm:$0xff] %v794_v0 }
 0x193   : > { %v789_v2 = vpop.permute.xlu0 %788 }
 0x194   : > { %v795_v3 = vsel %vm311_vm3, %v782_v29, %v789_v2 }
 0x195   : > { %799 = vst [vmem:[%s278_s13 + $0x18] sm:$0xff] %v795_v3 }
 0x1a6   : > { %v681_v5 = vpop.f32.mrf.mxu3 }
 0x1ae   : > { %v683_v12 = vpop.f32.mrf.mxu3 }
 0x200   : > { %v667_v6 = vpop.f32.mrf.mxu1 }
 0x201   : > { %v668_v7 = vadd.f32 %v1083_v4, %v667_v6 }
 0x203   : > { %v682_v8 = vadd.f32 %v681_v5, %v668_v7 }
 0x205   : > { %v792_v9 = vsel %vm311_vm3, %v682_v8, %v1403_v24 }
 0x206   : > { %796 = vst [vmem:[%s278_s13] sm:$0xff] %v792_v9 }
 0x208   : > { %v669_v10 = vpop.f32.mrf.mxu1 }
 0x209   : > { %v670_v11 = vadd.f32 %v1083_v4, %v669_v10 }
 0x20b   : > { %v684_v13 = vadd.f32 %v683_v12, %v670_v11 }
 0x20d   : > { %v793_v14 = vsel %vm311_vm3, %v684_v13, %v1405_v27 }
 0x20e   : > { %798 = vst [vmem:[%s278_s13 + $0x10] sm:$0xff] %v793_v14 }
 0x20f PF: > { %s17_s24 = sadd.s32 1, %s1090_s24  }
 0x210   : > { %p14_p4 = scmp.ge.s32.totalorder %s17_s24, 4  }
 0x212   :  { %16 = sbr.rel (!%p14_p4) target bundleno = 1 (0x1), region = 78 }

</bundles_post_ra>
